<compile_context>
chip_gen: v7x
topology: tpu7x:2x2x1
jax: 0.10.0
libtpu: 0.0.40
codegen_flags: <defaults>
</compile_context>

<pallas_src>
import functools

import jax
import jax.numpy as jnp
import numpy as np
from jax.experimental import pallas as pl
from jax.experimental.pallas import tpu as pltpu

LANE = 128


def _pad_to(n, m):
    return ((n + m - 1) // m) * m


def _relu_fc_kernel(x_ref, w1_ref, b1_ref, w2_ref, b2_ref, w3_ref, b3_ref, o_ref):
    cdt = w1_ref.dtype  # compute dtype (f32 or bf16); accumulation is always f32.
    # fc1 + ReLU : (bb, D) @ (D, H1) -> lane-dense (bb, H1), f32 accumulate.
    h1 = jnp.dot(x_ref[...], w1_ref[...], preferred_element_type=jnp.float32)
    h1 = jnp.maximum(h1 + b1_ref[...], 0.0)
    # fc2 + ReLU : (bb, H1) @ (H1, H2)
    h2 = jnp.dot(h1.astype(cdt), w2_ref[...], preferred_element_type=jnp.float32)
    h2 = jnp.maximum(h2 + b2_ref[...], 0.0)
    # fc3 : (bb, H2) @ (H2, P)   (P already padded to 128 -> unmasked stores)
    o = jnp.dot(h2.astype(cdt), w3_ref[...], preferred_element_type=jnp.float32)
    o_ref[...] = (o + b3_ref[...]).astype(o_ref.dtype)


def prepare_params(w1, b1, w2, b2, w3, b3, *, compute_dtype=jnp.float32):
    """One-time prep: transpose PyTorch nn.Linear weights and zero-pad every
    feature dim to a multiple of 128.  Cache the result alongside the model."""
    hid1, d_in = w1.shape
    hid2 = w2.shape[0]
    pred = w3.shape[0]
    D, H1, H2, P = (_pad_to(n, LANE) for n in (d_in, hid1, hid2, pred))

    cdt = compute_dtype
    f32 = jnp.float32
    w1_t = jnp.zeros((D, H1), cdt).at[:d_in, :hid1].set(jnp.transpose(w1).astype(cdt))
    b1_p = jnp.zeros((1, H1), f32).at[:, :hid1].set(b1.astype(f32))
    w2_t = jnp.zeros((H1, H2), cdt).at[:hid1, :hid2].set(jnp.transpose(w2).astype(cdt))
    b2_p = jnp.zeros((1, H2), f32).at[:, :hid2].set(b2.astype(f32))
    w3_t = jnp.zeros((H2, P), cdt).at[:hid2, :pred].set(jnp.transpose(w3).astype(cdt))
    b3_p = jnp.zeros((1, P), f32).at[:, :pred].set(b3.astype(f32))

    return {
        "w1_t": w1_t, "b1": b1_p, "w2_t": w2_t, "b2": b2_p, "w3_t": w3_t, "b3": b3_p,
        "d_in": d_in, "pred": pred, "D": D, "H1": H1, "H2": H2, "P": P,
        "compute_dtype": cdt,
    }


def relu_fc_net_forward(x, params, *, block_b=512):
    """x: [B, input_size].  params: output of prepare_params().
    Returns [B, pred_size] float32."""
    B, d_in = x.shape
    assert d_in == params["d_in"]
    D, P, pred = params["D"], params["P"], params["pred"]
    cdt = params["compute_dtype"]

    # Batch tile: whole (sublane-padded) batch in one step if small, else
    # block_b-row tiles.  Multiple of 8 satisfies the (8,128) constraint.
    bb = min(_pad_to(block_b, 8), _pad_to(B, 8))
    grid_b = pl.cdiv(B, bb)
    B_pad = grid_b * bb

    x_in = x.astype(cdt)
    pad_rows, pad_cols = B_pad - B, D - d_in
    if pad_rows or pad_cols:
        x_in = jnp.pad(x_in, ((0, pad_rows), (0, pad_cols)))

    H1, H2 = params["H1"], params["H2"]
    out = pl.pallas_call(
        _relu_fc_kernel,
        out_shape=jax.ShapeDtypeStruct((B_pad, P), jnp.float32),
        grid=(grid_b,),
        in_specs=[
            pl.BlockSpec((bb, D), lambda i: (i, 0)),     # x tile (lane-dense)
            pl.BlockSpec((D, H1), lambda i: (0, 0)),     # W1^T (VMEM-resident)
            pl.BlockSpec((1, H1), lambda i: (0, 0)),     # b1
            pl.BlockSpec((H1, H2), lambda i: (0, 0)),    # W2^T
            pl.BlockSpec((1, H2), lambda i: (0, 0)),     # b2
            pl.BlockSpec((H2, P), lambda i: (0, 0)),     # W3^T (padded to 128 cols)
            pl.BlockSpec((1, P), lambda i: (0, 0)),      # b3
        ],
        out_specs=pl.BlockSpec((bb, P), lambda i: (i, 0)),  # lane-dense output
        compiler_params=pltpu.CompilerParams(
            dimension_semantics=("parallel",)),
    )(x_in, params["w1_t"], params["b1"], params["w2_t"], params["b2"],
      params["w3_t"], params["b3"])

    return out[:B, :pred]


def _reference(x, w1, b1, w2, b2, w3, b3):
    h1 = jax.nn.relu(x @ w1.T + b1)
    h2 = jax.nn.relu(h1 @ w2.T + b2)
    return h2 @ w3.T + b3


# TODO(synk): forward_optnet's qpth/QPFunction QP layer and the SGD training
# loops (fit / fit_optnet) have no clean Pallas equivalent and are not
# implemented; only the forward() pass is kernelized.

if __name__ == "__main__":
    # Shapes implied by the module: ReluFCNet(input_size, pred_size, T, hid1=100, hid2=50)
    B, D_IN, HID1, HID2, PRED = 64, 24, 100, 50, 12

    key = jax.random.PRNGKey(0)
    ks = jax.random.split(key, 7)

    def u(k, shape, fan_in):
        bound = 1.0 / np.sqrt(fan_in)   # PyTorch nn.Linear default init scale
        return jax.random.uniform(k, shape, jnp.float32, -bound, bound)

    x = jax.random.normal(ks[0], (B, D_IN), dtype=jnp.float32)
    w1 = u(ks[1], (HID1, D_IN), D_IN)
    b1 = u(ks[2], (HID1,), D_IN)
    w2 = u(ks[3], (HID2, HID1), HID1)
    b2 = u(ks[4], (HID2,), HID1)
    w3 = u(ks[5], (PRED, HID2), HID2)
    b3 = u(ks[6], (PRED,), HID2)

    # One-time parameter prep (padded/transposed weights) hoisted out of forward.
    params = jax.tree_util.tree_map(
        lambda v: jax.block_until_ready(v) if isinstance(v, jax.Array) else v,
        prepare_params(w1, b1, w2, b2, w3, b3, compute_dtype=jnp.float32))

    y = relu_fc_net_forward(x, params)
    jax.block_until_ready(y)

    y_ref = _reference(x, w1, b1, w2, b2, w3, b3)
    assert y.shape == (B, PRED)
    np.testing.assert_allclose(np.asarray(y), np.asarray(y_ref), rtol=1e-5, atol=1e-5)

    print("KERNEL_OK")
</pallas_src>

<mosaic_0001>
module attributes {stable_mosaic.version = 11 : i64} {
  func.func @_relu_fc_kernel(%arg0: i32, %arg1: memref<64x128xf32, #tpu.memory_space<vmem>>, %arg2: memref<128x128xf32, #tpu.memory_space<vmem>>, %arg3: memref<1x128xf32, #tpu.memory_space<vmem>>, %arg4: memref<128x128xf32, #tpu.memory_space<vmem>>, %arg5: memref<1x128xf32, #tpu.memory_space<vmem>>, %arg6: memref<128x128xf32, #tpu.memory_space<vmem>>, %arg7: memref<1x128xf32, #tpu.memory_space<vmem>>, %arg8: memref<64x128xf32, #tpu.memory_space<vmem>>) attributes {dimension_semantics = [#tpu.dimension_semantics<parallel>], iteration_bounds = array<i64: 1>, scalar_prefetch = 0 : i64, scratch_operands = 0 : i64, tpu.core_type = #tpu.core_type<tc>, window_params = [{transform_indices = @transform_0, window_bounds = array<i64: 64, 128>}, {pipeline_mode = #tpu.pipeline_mode<synchronous>, transform_indices = @transform_1, window_bounds = array<i64: 128, 128>}, {pipeline_mode = #tpu.pipeline_mode<synchronous>, transform_indices = @transform_2, window_bounds = array<i64: 1, 128>}, {pipeline_mode = #tpu.pipeline_mode<synchronous>, transform_indices = @transform_3, window_bounds = array<i64: 128, 128>}, {pipeline_mode = #tpu.pipeline_mode<synchronous>, transform_indices = @transform_4, window_bounds = array<i64: 1, 128>}, {pipeline_mode = #tpu.pipeline_mode<synchronous>, transform_indices = @transform_5, window_bounds = array<i64: 128, 128>}, {pipeline_mode = #tpu.pipeline_mode<synchronous>, transform_indices = @transform_6, window_bounds = array<i64: 1, 128>}, {transform_indices = @transform_7, window_bounds = array<i64: 64, 128>}]} {
    %c0 = arith.constant 0 : index
    %c0_0 = arith.constant 0 : index
    %0 = vector.load %arg1[%c0, %c0_0] : memref<64x128xf32, #tpu.memory_space<vmem>>, vector<64x128xf32>
    %c0_1 = arith.constant 0 : index
    %c0_2 = arith.constant 0 : index
    %1 = vector.load %arg2[%c0_1, %c0_2] : memref<128x128xf32, #tpu.memory_space<vmem>>, vector<128x128xf32>
    %cst = arith.constant dense<0.000000e+00> : vector<64x128xf32>
    %2 = tpu.matmul %0, %1, %cst {dimension_numbers = #tpu.dot_dimension_numbers<[1], [0], [0], [1], [0, 0, 1, 1], [], []>} : vector<64x128xf32>, vector<128x128xf32>, vector<64x128xf32> -> vector<64x128xf32>
    %c0_3 = arith.constant 0 : index
    %c0_4 = arith.constant 0 : index
    %3 = vector.load %arg3[%c0_3, %c0_4] : memref<1x128xf32, #tpu.memory_space<vmem>>, vector<1x128xf32>
    %4 = vector.broadcast %3 : vector<1x128xf32> to vector<64x128xf32>
    %5 = arith.addf %2, %4 : vector<64x128xf32>
    %cst_5 = arith.constant 0.000000e+00 : f32
    %6 = vector.broadcast %cst_5 : f32 to vector<64x128xf32>
    %7 = arith.maximumf %5, %6 : vector<64x128xf32>
    %c0_6 = arith.constant 0 : index
    %c0_7 = arith.constant 0 : index
    %8 = vector.load %arg4[%c0_6, %c0_7] : memref<128x128xf32, #tpu.memory_space<vmem>>, vector<128x128xf32>
    %cst_8 = arith.constant dense<0.000000e+00> : vector<64x128xf32>
    %9 = tpu.matmul %7, %8, %cst_8 {dimension_numbers = #tpu.dot_dimension_numbers<[1], [0], [0], [1], [0, 0, 1, 1], [], []>} : vector<64x128xf32>, vector<128x128xf32>, vector<64x128xf32> -> vector<64x128xf32>
    %c0_9 = arith.constant 0 : index
    %c0_10 = arith.constant 0 : index
    %10 = vector.load %arg5[%c0_9, %c0_10] : memref<1x128xf32, #tpu.memory_space<vmem>>, vector<1x128xf32>
    %11 = vector.broadcast %10 : vector<1x128xf32> to vector<64x128xf32>
    %12 = arith.addf %9, %11 : vector<64x128xf32>
    %cst_11 = arith.constant 0.000000e+00 : f32
    %13 = vector.broadcast %cst_11 : f32 to vector<64x128xf32>
    %14 = arith.maximumf %12, %13 : vector<64x128xf32>
    %c0_12 = arith.constant 0 : index
    %c0_13 = arith.constant 0 : index
    %15 = vector.load %arg6[%c0_12, %c0_13] : memref<128x128xf32, #tpu.memory_space<vmem>>, vector<128x128xf32>
    %cst_14 = arith.constant dense<0.000000e+00> : vector<64x128xf32>
    %16 = tpu.matmul %14, %15, %cst_14 {dimension_numbers = #tpu.dot_dimension_numbers<[1], [0], [0], [1], [0, 0, 1, 1], [], []>} : vector<64x128xf32>, vector<128x128xf32>, vector<64x128xf32> -> vector<64x128xf32>
    %c0_15 = arith.constant 0 : index
    %c0_16 = arith.constant 0 : index
    %17 = vector.load %arg7[%c0_15, %c0_16] : memref<1x128xf32, #tpu.memory_space<vmem>>, vector<1x128xf32>
    %18 = vector.broadcast %17 : vector<1x128xf32> to vector<64x128xf32>
    %19 = arith.addf %16, %18 : vector<64x128xf32>
    %c0_17 = arith.constant 0 : index
    %c0_18 = arith.constant 0 : index
    %20 = vector.load %arg8[%c0_17, %c0_18] : memref<64x128xf32, #tpu.memory_space<vmem>>, vector<64x128xf32>
    tpu.vector_store %arg8[%c0_17, %c0_18], %19 {strides = array<i32>} : memref<64x128xf32, #tpu.memory_space<vmem>>, vector<64x128xf32>,
    return
  }
  func.func @transform_0(%arg0: i32) -> (i32, i32) {
    %c0_i32 = arith.constant 0 : i32
    %c0_i32_0 = arith.constant 0 : i32
    return %arg0, %c0_i32 : i32, i32
  }
  func.func @transform_1(%arg0: i32) -> (i32, i32) {
    %c0_i32 = arith.constant 0 : i32
    %c0_i32_0 = arith.constant 0 : i32
    %c0_i32_1 = arith.constant 0 : i32
    return %c0_i32, %c0_i32_0 : i32, i32
  }
  func.func @transform_2(%arg0: i32) -> (i32, i32) {
    %c0_i32 = arith.constant 0 : i32
    %c0_i32_0 = arith.constant 0 : i32
    %c0_i32_1 = arith.constant 0 : i32
    return %c0_i32, %c0_i32_0 : i32, i32
  }
  func.func @transform_3(%arg0: i32) -> (i32, i32) {
    %c0_i32 = arith.constant 0 : i32
    %c0_i32_0 = arith.constant 0 : i32
    %c0_i32_1 = arith.constant 0 : i32
    return %c0_i32, %c0_i32_0 : i32, i32
  }
  func.func @transform_4(%arg0: i32) -> (i32, i32) {
    %c0_i32 = arith.constant 0 : i32
    %c0_i32_0 = arith.constant 0 : i32
    %c0_i32_1 = arith.constant 0 : i32
    return %c0_i32, %c0_i32_0 : i32, i32
  }
  func.func @transform_5(%arg0: i32) -> (i32, i32) {
    %c0_i32 = arith.constant 0 : i32
    %c0_i32_0 = arith.constant 0 : i32
    %c0_i32_1 = arith.constant 0 : i32
    return %c0_i32, %c0_i32_0 : i32, i32
  }
  func.func @transform_6(%arg0: i32) -> (i32, i32) {
    %c0_i32 = arith.constant 0 : i32
    %c0_i32_0 = arith.constant 0 : i32
    %c0_i32_1 = arith.constant 0 : i32
    return %c0_i32, %c0_i32_0 : i32, i32
  }
  func.func @transform_7(%arg0: i32) -> (i32, i32) {
    %c0_i32 = arith.constant 0 : i32
    %c0_i32_0 = arith.constant 0 : i32
    return %arg0, %c0_i32 : i32, i32
  }
}

</mosaic_0001>

<bundles_post_ra>
// kernel: tpu_custom_call.1
= control target key start
LH: loop header
LB: loop body
LE: loop exit
PB: predicated region body
PF: predicated region fallthrough
CT: control target
= control target key end

     0   :  { %12 = vsyncpa [#allocation3], 0  ;;  %s1106_s0 = inlined_call_operand.hbm [shape: f32[64,128], index: 0, kind: input, shape index: {}]   ;;  %s1107_s1 = inlined_call_operand.hbm [shape: f32[128,128], index: 1, kind: input, shape index: {}]   ;;  %s1108_s2 = inlined_call_operand.vmem [shape: f32[1,128], index: 2, kind: input, shape index: {}]   ;;  %s1109_s3 = inlined_call_operand.hbm [shape: f32[128,128], index: 3, kind: input, shape index: {}]   ;;  %s1110_s4 = inlined_call_operand.vmem [shape: f32[1,128], index: 4, kind: input, shape index: {}]   ;;  %s1111_s5 = inlined_call_operand.hbm [shape: f32[128,128], index: 5, kind: input, shape index: {}]   ;;  %s1112_s6 = inlined_call_operand.vmem [shape: f32[1,128], index: 6, kind: input, shape index: {}]   ;;  %s1113_s7 = inlined_call_operand.hbm [shape: f32[64,128], index: 7, kind: output, shape index: {}]  }
   0x1   :  { %13 = vsyncpa [#allocation6], 0 }
   0x2   :  { %14 = vsyncpa [#allocation9], 0 }
   0x3   :  { %15 = vsyncpa [#allocation4], 0  ;;  %s961_s24 = smov [#allocation5]   ;;  %s962_s26 = smov [#allocation2]  }
   0x4   :  { %s33_s25 = sshll.u32 %s961_s24, 4  ;;  %s21_s27 = sshll.u32 %s962_s26, 4  ;;  %s34_s25 = int_to_ptr.vmem [resolvable:$true] %s33_s25  ;;  %s1008_s27 = int_to_ptr.vmem [resolvable:$true] %s21_s27 }
   0x5   :  { %s843_s30 = scalar_lea.hbm %s1107_s1, 2048 }
   0x6   :  { %p844_p0 = scmp.ne.s32.totalorder %s1107_s1, %s843_s30  ;;  %p847_p1 = scmp.lt.u32.totalorder %s843_s30, %s1107_s1 }
   0x8   :  { %p849_p2 = pnand %p847_p1, %p844_p0 }
   0xa   :  { %852 = shalt.err (!%p849_p2)
}
   0xb   :  { %s853_s12 = scalar_lea.vmem %s34_s25, 2048  ;;  %p858_p4 = scmp.lt.s32.totalorder %s34_s25, %s34_s25 }
   0xc   :  { %p854_p3 = scmp.ne.s32.totalorder %s34_s25, %s853_s12  ;;  %p859_p5 = scmp.lt.s32.totalorder %s853_s12, %s853_s12 }
   0xe   :  { %p860_p6 = por %p859_p5, %p858_p4 }
  0x10   :  { %p861_p7 = pnand %p860_p6, %p854_p3 }
  0x12   :  { %864 = shalt.err (!%p861_p7)
}
  0x13   :  { %s963_s13 = smov 128   ;;  %s964_s14 = smov 8  }
  0x14   :  { %39 = dma.hbm_to_vmem [thread:$0]  %s1107_s1, 2048, %s34_s25, [#allocation6], %s963_s13, %s963_s13, %s964_s14  }
  0x15   :  { %s865_s19 = scalar_lea.hbm %s1106_s0, 1024 }
  0x16   :  { %p866_p8 = scmp.ne.s32.totalorder %s1106_s0, %s865_s19  ;;  %p869_p9 = scmp.lt.u32.totalorder %s865_s19, %s1106_s0 }
  0x18   :  { %p871_p10 = pnand %p869_p9, %p866_p8 }
  0x1a   :  { %874 = shalt.err (!%p871_p10)
}
  0x1b   :  { %s875_s24 = scalar_lea.vmem %s1008_s27, 1024  ;;  %p880_p12 = scmp.lt.s32.totalorder %s1008_s27, %s1008_s27 }
  0x1c   :  { %p876_p11 = scmp.ne.s32.totalorder %s1008_s27, %s875_s24  ;;  %p881_p13 = scmp.lt.s32.totalorder %s875_s24, %s875_s24 }
  0x1e   :  { %p882_p0 = por %p881_p13, %p880_p12 }
  0x20   :  { %p883_p1 = pnand %p882_p0, %p876_p11 }
  0x22   :  { %886 = shalt.err (!%p883_p1)
}
  0x23   :  { %27 = dma.hbm_to_vmem [thread:$0]  %s1106_s0, 1024, %s1008_s27, [#allocation3], %s963_s13, %s963_s13, %s964_s14  }
  0x24   :  { %s965_s26 = smov [#allocation7]   ;;  %s966_s29 = smov [#allocation8]  }
  0x25   :  { %s47_s28 = sshll.u32 %s965_s26, 4  ;;  %s61_s30 = sshll.u32 %s966_s29, 4  ;;  %s48_s28 = int_to_ptr.vmem [resolvable:$true] %s47_s28  ;;  %s1045_s30 = int_to_ptr.vmem [resolvable:$true] %s61_s30 }
  0x26   :  { %s887_s10 = scalar_lea.hbm %s1109_s3, 2048 }
  0x27   :  { %p888_p2 = scmp.ne.s32.totalorder %s1109_s3, %s887_s10  ;;  %p891_p3 = scmp.lt.u32.totalorder %s887_s10, %s1109_s3 }
  0x29   :  { %p893_p4 = pnand %p891_p3, %p888_p2 }
  0x2b   :  { %896 = shalt.err (!%p893_p4)
}
  0x2c   :  { %s897_s0 = scalar_lea.vmem %s48_s28, 2048  ;;  %p902_p6 = scmp.lt.s32.totalorder %s48_s28, %s48_s28 }
  0x2d   :  { %p898_p5 = scmp.ne.s32.totalorder %s48_s28, %s897_s0  ;;  %p903_p7 = scmp.lt.s32.totalorder %s897_s0, %s897_s0 }
  0x2f   :  { %p904_p8 = por %p903_p7, %p902_p6 }
  0x31   :  { %p905_p9 = pnand %p904_p8, %p898_p5 }
  0x33   :  { %908 = shalt.err (!%p905_p9)
}
  0x34   :  { %53 = dma.hbm_to_vmem [thread:$0]  %s1109_s3, 2048, %s48_s28, [#allocation6], %s963_s13, %s963_s13, %s964_s14  }
  0x35   :  { %s909_s20 = scalar_lea.hbm %s1111_s5, 2048 }
  0x36   :  { %p910_p10 = scmp.ne.s32.totalorder %s1111_s5, %s909_s20  ;;  %p913_p11 = scmp.lt.u32.totalorder %s909_s20, %s1111_s5 }
  0x38   :  { %p915_p12 = pnand %p913_p11, %p910_p10 }
  0x3a   :  { %918 = shalt.err (!%p915_p12)
}
  0x3b   :  { %s919_s1 = scalar_lea.vmem %s1045_s30, 2048  ;;  %p924_p0 = scmp.lt.s32.totalorder %s1045_s30, %s1045_s30 }
  0x3c   :  { %p920_p13 = scmp.ne.s32.totalorder %s1045_s30, %s919_s1  ;;  %p925_p1 = scmp.lt.s32.totalorder %s919_s1, %s919_s1 }
  0x3e   :  { %p926_p2 = por %p925_p1, %p924_p0 }
  0x40   :  { %p927_p3 = pnand %p926_p2, %p920_p13 }
  0x42   :  { %930 = shalt.err (!%p927_p3)
}
  0x43   :  { %67 = dma.hbm_to_vmem [thread:$0]  %s1111_s5, 2048, %s1045_s30, [#allocation9], %s963_s13, %s963_s13, %s964_s14  }
  0x44   :  { %953 = dma.done.wait [#allocation3], 1024  }
  0x45   :  { %954 = vsyncadd [#allocation3], 4294966272 }
  0x46   :  { %955 = dma.done.wait [#allocation6], 4096  }
  0x47   :  { %956 = vsyncadd [#allocation6], 4294963200 }
  0x48   :  { %957 = dma.done.wait [#allocation9], 2048  }
  0x49   :  { %958 = vsyncadd [#allocation9], 4294965248  ;;  %v90_v0 = vld [vmem:[#allocation5] sm:$0xff]  ;;  %v91_v1 = vld [vmem:[#allocation5 + $0x8] sm:$0xff]  ;;  %s967_s30 = smov [#allocation10]  }
  0x4a   :  { %v92_v2 = vld [vmem:[#allocation5 + $0x10] sm:$0xff]  ;;  %v724_v3 = vpack.c.bf16 %v91_v1, %v90_v0  ;;  %v93_v4 = vld [vmem:[#allocation5 + $0x18] sm:$0xff]  ;;  %v94_v6 = vld [vmem:[#allocation5 + $0x20] sm:$0xff]  ;;  %s503_s8 = sshll.u32 %s967_s30, 4  ;;  %s504_s8 = int_to_ptr.vmem [resolvable:$true] %s503_s8 }
  0x4b   :  { %v728_v5 = vpack.c.bf16 %v93_v4, %v92_v2  ;;  %v95_v7 = vld [vmem:[#allocation5 + $0x28] sm:$0xff]  ;;  %v82_v9 = vld [vmem:[#allocation2] sm:$0xff]  ;;  %v96_v10 = vld [vmem:[#allocation5 + $0x30] sm:$0xff]  ;;  %p936_p5 = scmp.lt.s32.totalorder %s504_s8, %s504_s8 }
  0x4c   :  { %725 = vmatprep.subr.bf16.mxu0 %v724_v3  ;;  %v732_v8 = vpack.c.bf16 %v95_v7, %v94_v6  ;;  %v97_v11 = vld [vmem:[#allocation5 + $0x38] sm:$0xff]  ;;  %624 = vmatprep.mubr.f32.mxu0 %v82_v9  ;;  %v226_v12 = vld [vmem:[#allocation7] sm:$0xff]  ;;  %v227_v13 = vld [vmem:[#allocation7 + $0x8] sm:$0xff] }
  0x4d   :  { %727 = vmatpush3.bf16.msra.mxu0 %v724_v3  ;;  %v228_v14 = vld [vmem:[#allocation7 + $0x10] sm:$0xff]  ;;  %v736_v15 = vpack.c.bf16 %v97_v11, %v96_v10  ;;  %v98_v16 = vld [vmem:[#allocation5 + $0x40] sm:$0xff]  ;;  %v756_v17 = vpack.c.bf16 %v227_v13, %v226_v12  ;;  %v229_v18 = vld [vmem:[#allocation7 + $0x18] sm:$0xff] }
  0x4e   :  { %729 = vmatprep.subr.bf16.mxu0 %v728_v5  ;;  %v99_v19 = vld [vmem:[#allocation5 + $0x48] sm:$0xff]  ;;  %v760_v20 = vpack.c.bf16 %v229_v18, %v228_v14  ;;  %v230_v21 = vld [vmem:[#allocation7 + $0x20] sm:$0xff]  ;;  %v100_v24 = vld [vmem:[#allocation5 + $0x50] sm:$0xff] }
  0x4f   :  { %v231_v22 = vld [vmem:[#allocation7 + $0x28] sm:$0xff]  ;;  %757 = vmatprep.subr.bf16.mxu1 %v756_v17  ;;  %v740_v23 = vpack.c.bf16 %v99_v19, %v98_v16  ;;  %v101_v26 = vld [vmem:[#allocation5 + $0x58] sm:$0xff]  ;;  %v232_v27 = vld [vmem:[#allocation7 + $0x30] sm:$0xff] }
  0x50   :  { %759 = vmatpush3.bf16.msra.mxu1 %v756_v17  ;;  %v764_v25 = vpack.c.bf16 %v231_v22, %v230_v21  ;;  %v233_v28 = vld [vmem:[#allocation7 + $0x38] sm:$0xff]  ;;  %v744_v29 = vpack.c.bf16 %v101_v26, %v100_v24  ;;  %v102_v30 = vld [vmem:[#allocation5 + $0x60] sm:$0xff]  ;;  %v103_v32 = vld [vmem:[#allocation5 + $0x68] sm:$0xff] }
  0x51   :  { %731 = vmatpush3.bf16.msra.mxu0 %v728_v5  ;;  %761 = vmatprep.subr.bf16.mxu1 %v760_v20  ;;  %v768_v31 = vpack.c.bf16 %v233_v28, %v232_v27  ;;  %v234_v33 = vld [vmem:[#allocation7 + $0x40] sm:$0xff]  ;;  %v235_v34 = vld [vmem:[#allocation7 + $0x48] sm:$0xff]  ;;  %v748_v35 = vpack.c.bf16 %v103_v32, %v102_v30  ;;  %v104_v36 = vld [vmem:[#allocation5 + $0x70] sm:$0xff] }
  0x52   :  { %733 = vmatprep.subr.bf16.mxu0 %v732_v8  ;;  %v772_v37 = vpack.c.bf16 %v235_v34, %v234_v33  ;;  %v105_v38 = vld [vmem:[#allocation5 + $0x78] sm:$0xff]  ;;  %v236_v39 = vld [vmem:[#allocation7 + $0x50] sm:$0xff]  ;;  %v238_v43 = vld [vmem:[#allocation7 + $0x60] sm:$0xff] }
  0x53   :  { %v237_v40 = vld [vmem:[#allocation7 + $0x58] sm:$0xff]  ;;  %v752_v41 = vpack.c.bf16 %v105_v38, %v104_v36  ;;  %v239_v44 = vld [vmem:[#allocation7 + $0x68] sm:$0xff]  ;;  %v84_v47 = vld [vmem:[#allocation2 + $0x10] sm:$0xff] }
  0x54   :  { %763 = vmatpush3.bf16.msra.mxu1 %v760_v20  ;;  %v776_v42 = vpack.c.bf16 %v237_v40, %v236_v39  ;;  %v780_v45 = vpack.c.bf16 %v239_v44, %v238_v43  ;;  %v83_v46 = vld [vmem:[#allocation2 + $0x8] sm:$0xff]  ;;  %v85_v48 = vld [vmem:[#allocation2 + $0x18] sm:$0xff]  ;;  %v86_v49 = vld [vmem:[#allocation2 + $0x20] sm:$0xff] }
  0x55   :  { %735 = vmatpush3.bf16.msra.mxu0 %v732_v8  ;;  %765 = vmatprep.subr.bf16.mxu1 %v764_v25  ;;  %v87_v50 = vld [vmem:[#allocation2 + $0x28] sm:$0xff]  ;;  %v88_v51 = vld [vmem:[#allocation2 + $0x30] sm:$0xff]  ;;  %v89_v52 = vld [vmem:[#allocation2 + $0x38] sm:$0xff] }
  0x56   :  { %737 = vmatprep.subr.bf16.mxu0 %v736_v15  ;;  %v240_v53 = vld [vmem:[#allocation7 + $0x70] sm:$0xff]  ;;  %v241_v54 = vld [vmem:[#allocation7 + $0x78] sm:$0xff]  ;;  %v362_v56 = vld [vmem:[#allocation8] sm:$0xff] }
  0x57   :  { %v784_v55 = vpack.c.bf16 %v241_v54, %v240_v53  ;;  %v363_v57 = vld [vmem:[#allocation8 + $0x8] sm:$0xff]  ;;  %v364_v58 = vld [vmem:[#allocation8 + $0x10] sm:$0xff]  ;;  %v365_v60 = vld [vmem:[#allocation8 + $0x18] sm:$0xff] }
  0x58   :  { %767 = vmatpush3.bf16.msra.mxu1 %v764_v25  ;;  %v788_v59 = vpack.c.bf16 %v363_v57, %v362_v56  ;;  %v792_v61 = vpack.c.bf16 %v365_v60, %v364_v58  ;;  %v366_v62 = vld [vmem:[#allocation8 + $0x20] sm:$0xff]  ;;  %v367_v63 = vld [vmem:[#allocation8 + $0x28] sm:$0xff]  ;;  %v368_v1 = vld [vmem:[#allocation8 + $0x30] sm:$0xff] }
  0x59   :  { %739 = vmatpush3.bf16.msra.mxu0 %v736_v15  ;;  %769 = vmatprep.subr.bf16.mxu1 %v768_v31  ;;  %v796_v0 = vpack.c.bf16 %v367_v63, %v366_v62  ;;  %v369_v2 = vld [vmem:[#allocation8 + $0x38] sm:$0xff]  ;;  %v370_v4 = vld [vmem:[#allocation8 + $0x40] sm:$0xff]  ;;  %v371_v5 = vld [vmem:[#allocation8 + $0x48] sm:$0xff] }
  0x5a   :  { %741 = vmatprep.subr.bf16.mxu0 %v740_v23  ;;  %v800_v3 = vpack.c.bf16 %v369_v2, %v368_v1  ;;  %v804_v6 = vpack.c.bf16 %v371_v5, %v370_v4  ;;  %v372_v7 = vld [vmem:[#allocation8 + $0x50] sm:$0xff]  ;;  %v373_v8 = vld [vmem:[#allocation8 + $0x58] sm:$0xff]  ;;  %v374_v10 = vld [vmem:[#allocation8 + $0x60] sm:$0xff] }
  0x5b   :  { %v808_v9 = vpack.c.bf16 %v373_v8, %v372_v7  ;;  %v375_v11 = vld [vmem:[#allocation8 + $0x68] sm:$0xff]  ;;  %v517_v13 = vld [vmem:[%s1108_s2] ss:$0 sm:$0xff]  ;;  %v376_v38 = vld [vmem:[#allocation8 + $0x70] sm:$0xff] }
  0x5c   :  { %771 = vmatpush3.bf16.msra.mxu1 %v768_v31  ;;  %v812_v12 = vpack.c.bf16 %v375_v11, %v374_v10  ;;  %v377_v39 = vld [vmem:[#allocation8 + $0x78] sm:$0xff]  ;;  %v519_v2 = vld [vmem:[%s1112_s6] ss:$0 sm:$0xff]  ;;  %s931_s6 = scalar_lea.vmem %s504_s8, 1024 }
  0x5d   :  { %743 = vmatpush3.bf16.msra.mxu0 %v740_v23  ;;  %773 = vmatprep.subr.bf16.mxu1 %v772_v37  ;;  %v816_v40 = vpack.c.bf16 %v377_v39, %v376_v38  ;;  %p932_p4 = scmp.ne.s32.totalorder %s504_s8, %s931_s6  ;;  %p937_p6 = scmp.lt.s32.totalorder %s931_s6, %s931_s6 }
  0x5e   :  { %745 = vmatprep.subr.bf16.mxu0 %v744_v29 }
  0x5f   :  { %p938_p7 = por %p937_p6, %p936_p5 }
  0x60   :  { %775 = vmatpush3.bf16.msra.mxu1 %v772_v37 }
  0x61   :  { %747 = vmatpush3.bf16.msra.mxu0 %v744_v29  ;;  %777 = vmatprep.subr.bf16.mxu1 %v776_v42  ;;  %p939_p8 = pnand %p938_p7, %p932_p4 }
  0x62   :  { %749 = vmatprep.subr.bf16.mxu0 %v748_v35 }
  0x64   :  { %779 = vmatpush3.bf16.msra.mxu1 %v776_v42 }
  0x65   :  { %751 = vmatpush3.bf16.msra.mxu0 %v748_v35  ;;  %781 = vmatprep.subr.bf16.mxu1 %v780_v45 }
  0x66   :  { %753 = vmatprep.subr.bf16.mxu0 %v752_v41 }
  0x68   :  { %783 = vmatpush3.bf16.msra.mxu1 %v780_v45 }
  0x69   :  { %755 = vmatpush3.bf16.msra.mxu0 %v752_v41  ;;  %785 = vmatprep.subr.bf16.mxu1 %v784_v55  ;;  %v518_v41 = vld [vmem:[%s1110_s4] ss:$0 sm:$0xff] }
  0x6a   :  { %789 = vmatprep.subr.bf16.mxu0 %v788_v59 }
  0x6c   :  { %625 = vmatmul.mubr.f32.vlgmr.msra.gmra.mrb[0].mxu0 %v83_v46  ;;  %787 = vmatpush3.bf16.msra.mxu1 %v784_v55 }
  0x6d   :  { %627 = vmatprep.mubr.f32.mxu0 %v84_v47  ;;  %820 = vmatprep.subr.bf16.mxu1 %v788_v59 }
  0x6e   :  { %791 = vmatpush3.bf16.msra.mxu0 %v788_v59 }
  0x6f   :  { %793 = vmatprep.subr.bf16.mxu0 %v792_v61 }
  0x70   :  { %628 = vmatmul.mubr.f32.gmra.mrb[2].mxu0 %v85_v48 }
  0x71   :  { %630 = vmatprep.mubr.f32.mxu0 %v86_v49 }
  0x72   :  { %795 = vmatpush3.bf16.msra.mxu0 %v792_v61 }
  0x73   :  { %797 = vmatprep.subr.bf16.mxu0 %v796_v0 }
  0x74   :  { %631 = vmatmul.mubr.f32.gmra.mrb[4].mxu0 %v87_v50 }
  0x75   :  { %633 = vmatprep.mubr.f32.mxu0 %v88_v51 }
  0x76   :  { %799 = vmatpush3.bf16.msra.mxu0 %v796_v0 }
  0x77   :  { %801 = vmatprep.subr.bf16.mxu0 %v800_v3 }
  0x78   :  { %634 = vmatmul.mubr.f32.gmra.mrb[6].mxu0 %v89_v52 }
  0x7a   :  { %803 = vmatpush3.bf16.msra.mxu0 %v800_v3 }
  0x7b   :  { %805 = vmatprep.subr.bf16.mxu0 %v804_v6 }
  0x7e   :  { %807 = vmatpush3.bf16.msra.mxu0 %v804_v6 }
  0x7f   :  { %809 = vmatprep.subr.bf16.mxu0 %v808_v9 }
  0x82   :  { %811 = vmatpush3.bf16.msra.mxu0 %v808_v9 }
  0x83   :  { %813 = vmatprep.subr.bf16.mxu0 %v812_v12 }
  0x86   :  { %815 = vmatpush3.bf16.msra.mxu0 %v812_v12 }
  0x87   :  { %817 = vmatprep.subr.bf16.mxu0 %v816_v40 }
  0x8a   :  { %819 = vmatpush3.bf16.msra.mxu0 %v816_v40 }
 0x13f   :  { %v626_v14 = vpop.f32.mrb[0].mxu0 }
 0x140   :  { %v185_v15 = vadd.f32 %v626_v14, %v517_v13  ;;  %v179_v16 = vpop.f32.mrb[1].mxu0 }
 0x141   :  { %v180_v17 = vadd.f32 %v517_v13, %v179_v16 }
 0x142   :  { %v219_v20 = vmax.f32 %v185_v15, 0.0 }
 0x143   :  { %v629_v18 = vpop.f32.mrb[2].mxu0  ;;  %v218_v19 = vmax.f32 %v180_v17, 0.0 }
 0x144   :  { %v195_v21 = vadd.f32 %v629_v18, %v517_v13  ;;  %v189_v22 = vpop.f32.mrb[3].mxu0 }
 0x145   :  { %v190_v23 = vadd.f32 %v517_v13, %v189_v22  ;;  %668 = vmatprep.mubr.f32.mxu1 %v218_v19 }
 0x146   :  { %669 = vmatmul.mubr.f32.vlgmr.msra.gmra.mrb[0].mxu1 %v219_v20  ;;  %v221_v26 = vmax.f32 %v195_v21, 0.0 }
 0x147   :  { %v220_v24 = vmax.f32 %v190_v23, 0.0  ;;  %v632_v25 = vpop.f32.mrb[4].mxu0  ;;  %828 = vmatpush3.bf16.msra.mxu1 %v788_v59 }
 0x148   :  { %v205_v27 = vadd.f32 %v632_v25, %v517_v13  ;;  %v199_v28 = vpop.f32.mrb[5].mxu0  ;;  %821 = vmatprep.subr.bf16.mxu1 %v792_v61 }
 0x149   :  { %v200_v29 = vadd.f32 %v517_v13, %v199_v28  ;;  %671 = vmatprep.mubr.f32.mxu1 %v220_v24 }
 0x14a   :  { %672 = vmatmul.mubr.f32.gmra.mrb[2].mxu1 %v221_v26  ;;  %v223_v32 = vmax.f32 %v205_v27, 0.0 }
 0x14b   :  { %v222_v30 = vmax.f32 %v200_v29, 0.0  ;;  %v635_v31 = vpop.f32.mrb[6].mxu0  ;;  %829 = vmatpush3.bf16.msra.mxu1 %v792_v61 }
 0x14c   :  { %v215_v33 = vadd.f32 %v635_v31, %v517_v13  ;;  %v209_v34 = vpop.f32.mrb[7].mxu0  ;;  %822 = vmatprep.subr.bf16.mxu1 %v796_v0 }
 0x14d   :  { %v210_v35 = vadd.f32 %v517_v13, %v209_v34  ;;  %674 = vmatprep.mubr.f32.mxu1 %v222_v30 }
 0x14e   :  { %675 = vmatmul.mubr.f32.gmra.mrb[4].mxu1 %v223_v32  ;;  %v225_v37 = vmax.f32 %v215_v33, 0.0 }
 0x14f   :  { %v224_v36 = vmax.f32 %v210_v35, 0.0  ;;  %830 = vmatpush3.bf16.msra.mxu1 %v796_v0 }
 0x150   :  { %823 = vmatprep.subr.bf16.mxu1 %v800_v3 }
 0x151   :  { %677 = vmatprep.mubr.f32.mxu1 %v224_v36 }
 0x152   :  { %678 = vmatmul.mubr.f32.gmra.mrb[6].mxu1 %v225_v37 }
 0x153   :  { %831 = vmatpush3.bf16.msra.mxu1 %v800_v3 }
 0x154   :  { %824 = vmatprep.subr.bf16.mxu1 %v804_v6 }
 0x157   :  { %832 = vmatpush3.bf16.msra.mxu1 %v804_v6 }
 0x158   :  { %825 = vmatprep.subr.bf16.mxu1 %v808_v9 }
 0x15b   :  { %833 = vmatpush3.bf16.msra.mxu1 %v808_v9 }
 0x15c   :  { %826 = vmatprep.subr.bf16.mxu1 %v812_v12 }
 0x15f   :  { %834 = vmatpush3.bf16.msra.mxu1 %v812_v12 }
 0x160   :  { %827 = vmatprep.subr.bf16.mxu1 %v816_v40 }
 0x163   :  { %835 = vmatpush3.bf16.msra.mxu1 %v816_v40 }
 0x219   :  { %v670_v42 = vpop.f32.mrb[0].mxu1 }
 0x21a   :  { %v321_v43 = vadd.f32 %v670_v42, %v518_v41  ;;  %v315_v44 = vpop.f32.mrb[1].mxu1 }
 0x21b   :  { %v316_v45 = vadd.f32 %v518_v41, %v315_v44 }
 0x21c   :  { %v355_v48 = vmax.f32 %v321_v43, 0.0 }
 0x21d   :  { %v354_v46 = vmax.f32 %v316_v45, 0.0  ;;  %v673_v47 = vpop.f32.mrb[2].mxu1 }
 0x21e   :  { %v331_v49 = vadd.f32 %v673_v47, %v518_v41  ;;  %v325_v50 = vpop.f32.mrb[3].mxu1 }
 0x21f   :  { %v326_v51 = vadd.f32 %v518_v41, %v325_v50  ;;  %712 = vmatprep.mubr.f32.mxu0 %v354_v46 }
 0x220   :  { %713 = vmatmul.mubr.f32.vlgmr.msra.gmra.mrb[8].mxu0 %v355_v48  ;;  %v357_v54 = vmax.f32 %v331_v49, 0.0 }
 0x221   :  { %v356_v52 = vmax.f32 %v326_v51, 0.0  ;;  %v676_v53 = vpop.f32.mrb[4].mxu1 }
 0x222   :  { %v341_v55 = vadd.f32 %v676_v53, %v518_v41  ;;  %v335_v56 = vpop.f32.mrb[5].mxu1 }
 0x223   :  { %v336_v57 = vadd.f32 %v518_v41, %v335_v56  ;;  %715 = vmatprep.mubr.f32.mxu0 %v356_v52 }
 0x224   :  { %716 = vmatmul.mubr.f32.gmra.mrb[10].mxu0 %v357_v54  ;;  %v359_v60 = vmax.f32 %v341_v55, 0.0 }
 0x225   :  { %v358_v58 = vmax.f32 %v336_v57, 0.0  ;;  %v679_v59 = vpop.f32.mrb[6].mxu1 }
 0x226   :  { %v351_v61 = vadd.f32 %v679_v59, %v518_v41  ;;  %v345_v62 = vpop.f32.mrb[7].mxu1 }
 0x227   :  { %v346_v63 = vadd.f32 %v518_v41, %v345_v62  ;;  %718 = vmatprep.mubr.f32.mxu1 %v358_v58 }
 0x228   :  { %719 = vmatmul.mubr.f32.vlgmr.msra.gmra.mrb[8].mxu1 %v359_v60  ;;  %v361_v1 = vmax.f32 %v351_v61, 0.0 }
 0x229   :  { %v360_v0 = vmax.f32 %v346_v63, 0.0 }
 0x22b   :  { %721 = vmatprep.mubr.f32.mxu1 %v360_v0 }
 0x22c   :  { %722 = vmatmul.mubr.f32.gmra.mrb[10].mxu1 %v361_v1 }
 0x2f3   :  { %v714_v3 = vpop.f32.mrb[8].mxu0 }
 0x2f4   :  { %v457_v4 = vadd.f32 %v714_v3, %v519_v2  ;;  %v451_v5 = vpop.f32.mrb[9].mxu0 }
 0x2f5   :  { %v452_v6 = vadd.f32 %v519_v2, %v451_v5 }
 0x2f6   :  { %491 = vst [vmem:[#allocation10 + $0x8] sm:$0xff] %v457_v4 }
 0x2f7   :  { %490 = vst [vmem:[#allocation10] sm:$0xff] %v452_v6  ;;  %v717_v7 = vpop.f32.mrb[10].mxu0 }
 0x2f8   :  { %v467_v8 = vadd.f32 %v717_v7, %v519_v2  ;;  %v461_v9 = vpop.f32.mrb[11].mxu0 }
 0x2f9   :  { %v462_v10 = vadd.f32 %v519_v2, %v461_v9 }
 0x2fa   :  { %493 = vst [vmem:[#allocation10 + $0x18] sm:$0xff] %v467_v8 }
 0x2fb   :  { %492 = vst [vmem:[#allocation10 + $0x10] sm:$0xff] %v462_v10  ;;  %v720_v11 = vpop.f32.mrb[8].mxu1 }
 0x2fc   :  { %v477_v12 = vadd.f32 %v720_v11, %v519_v2  ;;  %v471_v13 = vpop.f32.mrb[9].mxu1 }
 0x2fd   :  { %v472_v14 = vadd.f32 %v519_v2, %v471_v13 }
 0x2fe   :  { %495 = vst [vmem:[#allocation10 + $0x28] sm:$0xff] %v477_v12 }
 0x2ff   :  { %494 = vst [vmem:[#allocation10 + $0x20] sm:$0xff] %v472_v14  ;;  %v723_v15 = vpop.f32.mrb[10].mxu1 }
 0x300   :  { %v487_v16 = vadd.f32 %v723_v15, %v519_v2  ;;  %v481_v17 = vpop.f32.mrb[11].mxu1 }
 0x301   :  { %v482_v18 = vadd.f32 %v519_v2, %v481_v17 }
 0x302   :  { %497 = vst [vmem:[#allocation10 + $0x38] sm:$0xff] %v487_v16 }
 0x303   :  { %496 = vst [vmem:[#allocation10 + $0x30] sm:$0xff] %v482_v18 }
 0x304   :  { %942 = shalt.err (!%p939_p8)
}
 0x305   :  { %s943_s11 = scalar_lea.hbm %s1113_s7, 1024 }
 0x306   :  { %p944_p9 = scmp.ne.s32.totalorder %s1113_s7, %s943_s11  ;;  %p947_p10 = scmp.lt.u32.totalorder %s943_s11, %s1113_s7 }
 0x308   :  { %p949_p11 = pnand %p947_p10, %p944_p9 }
 0x30a   :  { %952 = shalt.err (!%p949_p11)
}
 0x30b   :  { %509 = dma.vmem_to_hbm [thread:$0]  %s504_s8, 1024, %s1113_s7, [#allocation4], %s963_s13, %s963_s13, %s964_s14  }
 0x30c   :  { %959 = dma.done.wait [#allocation4], 1024  }
 0x30d   :  { %960 = vsyncadd [#allocation4], 4294966272 }
 0x30e   :  { %513 = vsyncpa [#allocation3], 1 }
 0x30f   :  { %514 = vsyncpa [#allocation6], 1 }
 0x310   :  { %515 = vsyncpa [#allocation9], 1 }
 0x311   :  { %516 = vsyncpa [#allocation4], 1 }

</bundles_post_ra>
